<compile_context>
chip_gen: v7x
topology: tpu7x:2x2x1
jax: 0.10.0
libtpu: 0.0.40
codegen_flags: <defaults>
</compile_context>

<pallas_src>
import functools

import jax
import jax.numpy as jnp
from jax.experimental import pallas as pl
from jax.experimental.pallas import tpu as pltpu

INPUT_SIZE = 384
HIDDEN_SIZE = 256
NUM_CLASSES = 5
PADDED_CLASSES = 128          # lane-dense class dim for fc2 / softmax math (in vregs)
OUT_PAD = 8                   # narrow HBM output width (5 real classes + 3 zeros)
NEG_BIG = -1e30               # padded-class bias (f32): exp(NEG_BIG - m) == 0 exactly


def _round_up(x, m):
    return ((x + m - 1) // m) * m


def mlp_kernel(x_ref, w1_ref, b1_ref, w2_ref, b2_ref, o_ref):
    # In-kernel f32 -> bf16 cast (VPU, hidden under the x DMA); MXU accumulates in f32.
    x_bf = x_ref[...].astype(jnp.bfloat16)
    h = jnp.dot(x_bf, w1_ref[...], preferred_element_type=jnp.float32)
    h = jnp.maximum(h + b1_ref[...], 0.0)                       # bias + ReLU in f32
    # fc2 against the lane-padded (HIDDEN, 128) bf16 weight; padded cols are zero.
    logits = jnp.dot(h.astype(jnp.bfloat16), w2_ref[...],
                     preferred_element_type=jnp.float32)
    logits = logits + b2_ref[...]                               # padded lanes: NEG_BIG
    # Numerically stable softmax over the 128 padded lanes, all in f32.
    m = jnp.max(logits, axis=1, keepdims=True)
    e = jnp.exp(logits - m)                                     # padded lanes -> exactly 0
    denom = jnp.sum(e, axis=1, keepdims=True)
    probs = e * pl.reciprocal(denom, approx=True)               # EUP slot (otherwise idle)
    # Narrow store: only the first OUT_PAD lanes go to HBM (classes 5..7 are exact 0).
    o_ref[...] = probs[:, :OUT_PAD].astype(o_ref.dtype)


def prepare_params(w1, b1, w2, b2):
    """One-time weight prep (cast/pad); do NOT redo this per forward call."""
    w1_bf = w1.astype(jnp.bfloat16)
    b1_f = b1.astype(jnp.float32)
    w2_p = jnp.zeros((HIDDEN_SIZE, PADDED_CLASSES), jnp.bfloat16)
    w2_p = w2_p.at[:, :NUM_CLASSES].set(w2.astype(jnp.bfloat16))
    # Keep b2 padding in f32: casting -1e30 to bf16 would overflow to -inf.
    b2_p = jnp.full((1, PADDED_CLASSES), NEG_BIG, jnp.float32)
    b2_p = b2_p.at[:, :NUM_CLASSES].set(b2.astype(jnp.float32))
    return w1_bf, b1_f, w2_p, b2_p


@functools.partial(jax.jit, static_argnames=("tb",))
def mlp_forward(x, w1_bf, b1_f, w2_p, b2_p, *, tb=1024):
    """x: (B, INPUT_SIZE) f32.  Weights must come from prepare_params()."""
    B = x.shape[0]
    # Minimal sublane alignment only (at most 7 padded rows).
    B_pad = _round_up(B, 8)
    if B_pad != B:
        x = jnp.pad(x, ((0, B_pad - B), (0, 0)))

    TB = min(tb, B_pad)
    # v7x megacore: keep >= 2 "parallel" grid steps whenever the batch allows it.
    if B_pad >= 16:
        TB = min(TB, _round_up(pl.cdiv(B_pad, 2), 8))
    grid = (pl.cdiv(B_pad, TB),)

    cost = pl.CostEstimate(
        flops=2 * B_pad * INPUT_SIZE * HIDDEN_SIZE
              + 2 * B_pad * HIDDEN_SIZE * PADDED_CLASSES,
        transcendentals=B_pad * PADDED_CLASSES,
        bytes_accessed=(B_pad * INPUT_SIZE * 4          # x (f32 in)
                        + INPUT_SIZE * HIDDEN_SIZE * 2  # w1 (bf16)
                        + HIDDEN_SIZE * PADDED_CLASSES * 2
                        + HIDDEN_SIZE * 4 + PADDED_CLASSES * 4
                        + B_pad * OUT_PAD * 4),         # narrow f32 output
    )

    out_pad = pl.pallas_call(
        mlp_kernel,
        out_shape=jax.ShapeDtypeStruct((B_pad, OUT_PAD), jnp.float32),
        grid=grid,
        in_specs=[
            pl.BlockSpec((TB, INPUT_SIZE), lambda i: (i, 0)),               # x tile (streamed)
            pl.BlockSpec((INPUT_SIZE, HIDDEN_SIZE), lambda i: (0, 0)),      # w1 (resident)
            pl.BlockSpec((1, HIDDEN_SIZE), lambda i: (0, 0)),               # b1 (resident)
            pl.BlockSpec((HIDDEN_SIZE, PADDED_CLASSES), lambda i: (0, 0)),  # w2 (resident)
            pl.BlockSpec((1, PADDED_CLASSES), lambda i: (0, 0)),            # b2 (resident)
        ],
        out_specs=pl.BlockSpec((TB, OUT_PAD), lambda i: (i, 0)),
        compiler_params=pltpu.CompilerParams(
            dimension_semantics=("parallel",)),
        cost_estimate=cost,
    )(x, w1_bf, b1_f, w2_p, b2_p)

    return out_pad[:B, :NUM_CLASSES]


def init_params(key):
    # Deterministic init mimicking nn.Linear: U(-1/sqrt(fan_in), 1/sqrt(fan_in)).
    k1, k2, k3, k4 = jax.random.split(key, 4)
    lim1 = 1.0 / jnp.sqrt(INPUT_SIZE)
    lim2 = 1.0 / jnp.sqrt(HIDDEN_SIZE)
    # stored as (in, out) == PyTorch weight.T
    w1 = jax.random.uniform(k1, (INPUT_SIZE, HIDDEN_SIZE), jnp.float32, -lim1, lim1)
    b1 = jax.random.uniform(k2, (1, HIDDEN_SIZE), jnp.float32, -lim1, lim1)
    w2 = jax.random.uniform(k3, (HIDDEN_SIZE, NUM_CLASSES), jnp.float32, -lim2, lim2)
    b2 = jax.random.uniform(k4, (1, NUM_CLASSES), jnp.float32, -lim2, lim2)
    return w1, b1, w2, b2


if __name__ == "__main__":
    key = jax.random.PRNGKey(0)
    kx, kp = jax.random.split(key)
    batch = 8
    x = jax.random.normal(kx, (batch, INPUT_SIZE), jnp.float32)
    w1, b1, w2, b2 = init_params(kp)

    # One-time weight prep (hoisted out of the per-call forward).
    w1_bf, b1_f, w2_p, b2_p = prepare_params(w1, b1, w2, b2)

    out = mlp_forward(x, w1_bf, b1_f, w2_p, b2_p)
    out = jax.block_until_ready(out)

    # plain-JAX f32 reference (kernel uses bf16 MXU operands + approx reciprocal,
    # so tolerance is relaxed accordingly)
    h_ref = jnp.maximum(x @ w1 + b1, 0.0)
    ref = jax.nn.softmax(h_ref @ w2 + b2, axis=1)

    assert out.shape == (batch, NUM_CLASSES)
    assert jnp.all(jnp.isfinite(out))
    assert jnp.allclose(out, ref, atol=2e-2, rtol=0.0)
    assert jnp.allclose(jnp.sum(out, axis=1), 1.0, atol=5e-3)

    print("KERNEL_OK")
</pallas_src>

<mosaic_0001>
module attributes {stable_mosaic.version = 11 : i64} {
  func.func @mlp_kernel(%arg0: i32, %arg1: memref<8x384xf32, #tpu.memory_space<vmem>>, %arg2: memref<384x256xbf16, #tpu.memory_space<vmem>>, %arg3: memref<1x256xf32, #tpu.memory_space<vmem>>, %arg4: memref<256x128xbf16, #tpu.memory_space<vmem>>, %arg5: memref<1x128xf32, #tpu.memory_space<vmem>>, %arg6: memref<8x8xf32, #tpu.memory_space<vmem>>) attributes {dimension_semantics = [#tpu.dimension_semantics<parallel>], iteration_bounds = array<i64: 1>, scalar_prefetch = 0 : i64, scratch_operands = 0 : i64, tpu.core_type = #tpu.core_type<tc>, window_params = [{transform_indices = @transform_0, window_bounds = array<i64: 8, 384>}, {pipeline_mode = #tpu.pipeline_mode<synchronous>, transform_indices = @transform_1, window_bounds = array<i64: 384, 256>}, {pipeline_mode = #tpu.pipeline_mode<synchronous>, transform_indices = @transform_2, window_bounds = array<i64: 1, 256>}, {pipeline_mode = #tpu.pipeline_mode<synchronous>, transform_indices = @transform_3, window_bounds = array<i64: 256, 128>}, {pipeline_mode = #tpu.pipeline_mode<synchronous>, transform_indices = @transform_4, window_bounds = array<i64: 1, 128>}, {transform_indices = @transform_5, window_bounds = array<i64: 8, 8>}]} {
    %c0 = arith.constant 0 : index
    %c0_0 = arith.constant 0 : index
    %0 = vector.load %arg1[%c0, %c0_0] : memref<8x384xf32, #tpu.memory_space<vmem>>, vector<8x384xf32>
    %1 = arith.truncf %0 : vector<8x384xf32> to vector<8x384xbf16>
    %c0_1 = arith.constant 0 : index
    %c0_2 = arith.constant 0 : index
    %2 = vector.load %arg2[%c0_1, %c0_2] : memref<384x256xbf16, #tpu.memory_space<vmem>>, vector<384x256xbf16>
    %cst = arith.constant dense<0.000000e+00> : vector<8x256xf32>
    %3 = tpu.matmul %1, %2, %cst {dimension_numbers = #tpu.dot_dimension_numbers<[1], [0], [0], [1], [0, 0, 1, 1], [], []>} : vector<8x384xbf16>, vector<384x256xbf16>, vector<8x256xf32> -> vector<8x256xf32>
    %c0_3 = arith.constant 0 : index
    %c0_4 = arith.constant 0 : index
    %4 = vector.load %arg3[%c0_3, %c0_4] : memref<1x256xf32, #tpu.memory_space<vmem>>, vector<1x256xf32>
    %5 = vector.broadcast %4 : vector<1x256xf32> to vector<8x256xf32>
    %6 = arith.addf %3, %5 : vector<8x256xf32>
    %cst_5 = arith.constant 0.000000e+00 : f32
    %7 = vector.broadcast %cst_5 : f32 to vector<8x256xf32>
    %8 = arith.maximumf %6, %7 : vector<8x256xf32>
    %9 = arith.truncf %8 : vector<8x256xf32> to vector<8x256xbf16>
    %c0_6 = arith.constant 0 : index
    %c0_7 = arith.constant 0 : index
    %10 = vector.load %arg4[%c0_6, %c0_7] : memref<256x128xbf16, #tpu.memory_space<vmem>>, vector<256x128xbf16>
    %cst_8 = arith.constant dense<0.000000e+00> : vector<8x128xf32>
    %11 = tpu.matmul %9, %10, %cst_8 {dimension_numbers = #tpu.dot_dimension_numbers<[1], [0], [0], [1], [0, 0, 1, 1], [], []>} : vector<8x256xbf16>, vector<256x128xbf16>, vector<8x128xf32> -> vector<8x128xf32>
    %c0_9 = arith.constant 0 : index
    %c0_10 = arith.constant 0 : index
    %12 = vector.load %arg5[%c0_9, %c0_10] : memref<1x128xf32, #tpu.memory_space<vmem>>, vector<1x128xf32>
    %13 = vector.broadcast %12 : vector<1x128xf32> to vector<8x128xf32>
    %14 = arith.addf %11, %13 : vector<8x128xf32>
    %cst_11 = arith.constant dense<0xFF800000> : vector<8xf32>
    %15 = vector.multi_reduction <maximumf>, %14, %cst_11 [1] : vector<8x128xf32> to vector<8xf32>
    %16 = vector.shape_cast %15 : vector<8xf32> to vector<8x1xf32>
    %17 = vector.broadcast %16 : vector<8x1xf32> to vector<8x128xf32>
    %18 = arith.subf %14, %17 : vector<8x128xf32>
    %19 = math.exp %18 : vector<8x128xf32>
    %cst_12 = arith.constant dense<0.000000e+00> : vector<8xf32>
    %20 = vector.multi_reduction <add>, %19, %cst_12 [1] : vector<8x128xf32> to vector<8xf32>
    %21 = vector.shape_cast %20 : vector<8xf32> to vector<8x1xf32>
    %22 = tpu.reciprocal %21 {approx = true} : vector<8x1xf32> -> vector<8x1xf32>
    %23 = vector.broadcast %22 : vector<8x1xf32> to vector<8x128xf32>
    %24 = arith.mulf %19, %23 : vector<8x128xf32>
    %25 = vector.extract_strided_slice %24 {offsets = [0, 0], sizes = [8, 8], strides = [1, 1]} : vector<8x128xf32> to vector<8x8xf32>
    %c0_13 = arith.constant 0 : index
    %c0_14 = arith.constant 0 : index
    %26 = vector.load %arg6[%c0_13, %c0_14] : memref<8x8xf32, #tpu.memory_space<vmem>>, vector<8x8xf32>
    tpu.vector_store %arg6[%c0_13, %c0_14], %25 {strides = array<i32>} : memref<8x8xf32, #tpu.memory_space<vmem>>, vector<8x8xf32>,
    return
  }
  func.func @transform_0(%arg0: i32) -> (i32, i32) {
    %c0_i32 = arith.constant 0 : i32
    %c0_i32_0 = arith.constant 0 : i32
    return %arg0, %c0_i32 : i32, i32
  }
  func.func @transform_1(%arg0: i32) -> (i32, i32) {
    %c0_i32 = arith.constant 0 : i32
    %c0_i32_0 = arith.constant 0 : i32
    %c0_i32_1 = arith.constant 0 : i32
    return %c0_i32, %c0_i32_0 : i32, i32
  }
  func.func @transform_2(%arg0: i32) -> (i32, i32) {
    %c0_i32 = arith.constant 0 : i32
    %c0_i32_0 = arith.constant 0 : i32
    %c0_i32_1 = arith.constant 0 : i32
    return %c0_i32, %c0_i32_0 : i32, i32
  }
  func.func @transform_3(%arg0: i32) -> (i32, i32) {
    %c0_i32 = arith.constant 0 : i32
    %c0_i32_0 = arith.constant 0 : i32
    %c0_i32_1 = arith.constant 0 : i32
    return %c0_i32, %c0_i32_0 : i32, i32
  }
  func.func @transform_4(%arg0: i32) -> (i32, i32) {
    %c0_i32 = arith.constant 0 : i32
    %c0_i32_0 = arith.constant 0 : i32
    %c0_i32_1 = arith.constant 0 : i32
    return %c0_i32, %c0_i32_0 : i32, i32
  }
  func.func @transform_5(%arg0: i32) -> (i32, i32) {
    %c0_i32 = arith.constant 0 : i32
    %c0_i32_0 = arith.constant 0 : i32
    return %arg0, %c0_i32 : i32, i32
  }
}

</mosaic_0001>

<bundles_post_ra>
// kernel: mlp_forward.1
= control target key start
LH: loop header
LB: loop body
LE: loop exit
PB: predicated region body
PF: predicated region fallthrough
CT: control target
= control target key end

     0   :  { %10 = vsyncpa [#allocation3], 0  ;;  %s1034_s0 = inlined_call_operand.hbm [shape: f32[8,384], index: 0, kind: input, shape index: {}]   ;;  %s1035_s1 = inlined_call_operand.hbm [shape: bf16[384,256], index: 1, kind: input, shape index: {}]   ;;  %s1036_s2 = inlined_call_operand.vmem [shape: f32[1,256], index: 2, kind: input, shape index: {}]   ;;  %s1037_s3 = inlined_call_operand.hbm [shape: bf16[256,128], index: 3, kind: input, shape index: {}]   ;;  %s1038_s4 = inlined_call_operand.vmem [shape: f32[1,128], index: 4, kind: input, shape index: {}]   ;;  %s1039_s5 = inlined_call_operand.hbm [shape: f32[8,8], index: 5, kind: output, shape index: {}]  }
   0x1   :  { %11 = vsyncpa [#allocation6], 0 }
   0x2   :  { %12 = vsyncpa [#allocation4], 0  ;;  %s941_s18 = smov [#allocation5]   ;;  %s847_s22 = scalar_lea.hbm %s1035_s1, 6144 }
   0x3   :  { %s28_s19 = sshll.u32 %s941_s18, 4  ;;  %p848_p0 = scmp.ne.s32.totalorder %s1035_s1, %s847_s22  ;;  %s29_s19 = int_to_ptr.vmem [resolvable:$true] %s28_s19 }
   0x4   :  { %p851_p1 = scmp.lt.u32.totalorder %s847_s22, %s1035_s1 }
   0x6   :  { %p853_p2 = pnand %p851_p1, %p848_p0 }
   0x8   :  { %856 = shalt.err (!%p853_p2)
}
   0x9   :  { %s857_s27 = scalar_lea.vmem %s29_s19, 6144  ;;  %p862_p4 = scmp.lt.s32.totalorder %s29_s19, %s29_s19 }
   0xa   :  { %p858_p3 = scmp.ne.s32.totalorder %s29_s19, %s857_s27  ;;  %p863_p5 = scmp.lt.s32.totalorder %s857_s27, %s857_s27 }
   0xc   :  { %p864_p6 = por %p863_p5, %p862_p4 }
   0xe   :  { %p865_p7 = pnand %p864_p6, %p858_p3 }
  0x10   :  { %868 = shalt.err (!%p865_p7)
}
  0x11   :  { %s942_s28 = smov 128   ;;  %s943_s29 = smov 8  }
  0x12   :  { %34 = dma.hbm_to_vmem [thread:$0]  %s1035_s1, 6144, %s29_s19, [#allocation6], %s942_s28, %s942_s28, %s943_s29  }
  0x13   :  { %s944_s7 = smov [#allocation2]   ;;  %s945_s9 = smov [#allocation7]  }
  0x14   :  { %s19_s8 = sshll.u32 %s944_s7, 4  ;;  %s42_s10 = sshll.u32 %s945_s9, 4  ;;  %s20_s8 = int_to_ptr.vmem [resolvable:$true] %s19_s8  ;;  %s43_s10 = int_to_ptr.vmem [resolvable:$true] %s42_s10 }
  0x15   :  { %s869_s13 = scalar_lea.hbm %s1034_s0, 384 }
  0x16   :  { %p870_p8 = scmp.ne.s32.totalorder %s1034_s0, %s869_s13  ;;  %p873_p9 = scmp.lt.u32.totalorder %s869_s13, %s1034_s0 }
  0x18   :  { %p875_p10 = pnand %p873_p9, %p870_p8 }
  0x1a   :  { %878 = shalt.err (!%p875_p10)
}
  0x1b   :  { %s879_s1 = scalar_lea.vmem %s20_s8, 384  ;;  %p884_p12 = scmp.lt.s32.totalorder %s20_s8, %s20_s8 }
  0x1c   :  { %p880_p11 = scmp.ne.s32.totalorder %s20_s8, %s879_s1  ;;  %p885_p13 = scmp.lt.s32.totalorder %s879_s1, %s879_s1 }
  0x1e   :  { %p886_p0 = por %p885_p13, %p884_p12 }
  0x20   :  { %p887_p1 = pnand %p886_p0, %p880_p11 }
  0x22   :  { %890 = shalt.err (!%p887_p1)
}
  0x23   :  { %22 = dma.hbm_to_vmem [thread:$0]  %s1034_s0, 384, %s20_s8, [#allocation3]  }
  0x24   :  { %s891_s22 = scalar_lea.hbm %s1037_s3, 2048 }
  0x25   :  { %p892_p2 = scmp.ne.s32.totalorder %s1037_s3, %s891_s22  ;;  %p895_p3 = scmp.lt.u32.totalorder %s891_s22, %s1037_s3 }
  0x27   :  { %p897_p4 = pnand %p895_p3, %p892_p2 }
  0x29   :  { %900 = shalt.err (!%p897_p4)
}
  0x2a   :  { %s901_s27 = scalar_lea.vmem %s43_s10, 2048  ;;  %p906_p6 = scmp.lt.s32.totalorder %s43_s10, %s43_s10 }
  0x2b   :  { %p902_p5 = scmp.ne.s32.totalorder %s43_s10, %s901_s27  ;;  %p907_p7 = scmp.lt.s32.totalorder %s901_s27, %s901_s27 }
  0x2d   :  { %p908_p8 = por %p907_p7, %p906_p6 }
  0x2f   :  { %p909_p9 = pnand %p908_p8, %p902_p5 }
  0x31   :  { %912 = shalt.err (!%p909_p9)
}
  0x32   :  { %s946_s0 = smov 64   ;;  %s947_s28 = smov 4  }
  0x33   :  { %48 = dma.hbm_to_vmem [thread:$0]  %s1037_s3, 2048, %s43_s10, [#allocation6], %s946_s0, %s946_s0, %s947_s28  }
  0x34   :  { %935 = dma.done.wait [#allocation3], 384  }
  0x35   :  { %936 = vsyncadd [#allocation3], 4294966912 }
  0x36   :  { %937 = dma.done.wait [#allocation6], 8192  }
  0x37   :  { %938 = vsyncadd [#allocation6], 4294959104  ;;  %v948_v0 = vmov 0   ;;  %v755_v1 = vld [vmem:[#allocation5 + $0x4] ss:$8 sps:$4 sm:$0xff]   ;;  %v62_v33 = vld [vmem:[#allocation2 + $0x8] sm:$0xff] }
  0x38   :  { %440 = vmatprep.mubr.bf16.mxu1 %v948_v0  ;;  %v757_v2 = vld [vmem:[#allocation5] ss:$8 sps:$4 sm:$0xff]   ;;  %367 = vmatprep.subr.bf16.mxu0 %v755_v1  ;;  %v758_v3 = vld [vmem:[#allocation5 + $0x14] ss:$8 sps:$4 sm:$0xff]   ;;  %v760_v4 = vld [vmem:[#allocation5 + $0x10] ss:$8 sps:$4 sm:$0xff]   ;;  %v65_v35 = vpack.c.bf16 %v62_v33, %v62_v33 }
  0x39   :  { %368 = vmatpush1.bf16.msra.mxu0 %v757_v2  ;;  %v761_v5 = vld [vmem:[#allocation5 + $0x24] ss:$8 sps:$4 sm:$0xff]   ;;  %v763_v6 = vld [vmem:[#allocation5 + $0x20] ss:$8 sps:$4 sm:$0xff]   ;;  %v764_v7 = vld [vmem:[#allocation5 + $0x34] ss:$8 sps:$4 sm:$0xff]  }
  0x3a   :  { %369 = vmatprep.subr.bf16.mxu0 %v758_v3  ;;  %v766_v8 = vld [vmem:[#allocation5 + $0x30] ss:$8 sps:$4 sm:$0xff]   ;;  %v779_v9 = vld [vmem:[#allocation5 + $0x104] ss:$8 sps:$4 sm:$0xff]   ;;  %v783_v11 = vld [vmem:[#allocation5 + $0x100] ss:$8 sps:$4 sm:$0xff]   ;;  %399 = vmatprep.mubr.bf16.mxu0 %v65_v35 }
  0x3b   :  { %v767_v10 = vld [vmem:[#allocation5 + $0x44] ss:$8 sps:$4 sm:$0xff]   ;;  %408 = vmatprep.subr.bf16.mxu1 %v779_v9  ;;  %v785_v12 = vld [vmem:[#allocation5 + $0x114] ss:$8 sps:$4 sm:$0xff]   ;;  %v769_v13 = vld [vmem:[#allocation5 + $0x40] ss:$8 sps:$4 sm:$0xff]  }
  0x3c   :  { %409 = vmatpush1.bf16.msra.mxu1 %v783_v11  ;;  %v770_v14 = vld [vmem:[#allocation5 + $0x54] ss:$8 sps:$4 sm:$0xff]   ;;  %v789_v15 = vld [vmem:[#allocation5 + $0x110] ss:$8 sps:$4 sm:$0xff]   ;;  %v791_v16 = vld [vmem:[#allocation5 + $0x124] ss:$8 sps:$4 sm:$0xff]   ;;  %v117_v11 = vlaneseq }
  0x3d   :  { %370 = vmatpush1.bf16.msra.mxu0 %v760_v4  ;;  %410 = vmatprep.subr.bf16.mxu1 %v785_v12  ;;  %v772_v17 = vld [vmem:[#allocation5 + $0x50] ss:$8 sps:$4 sm:$0xff]   ;;  %v795_v18 = vld [vmem:[#allocation5 + $0x120] ss:$8 sps:$4 sm:$0xff]   ;;  %v797_v19 = vld [vmem:[#allocation5 + $0x134] ss:$8 sps:$4 sm:$0xff]  }
  0x3e   :  { %371 = vmatprep.subr.bf16.mxu0 %v761_v5  ;;  %v773_v20 = vld [vmem:[#allocation5 + $0x64] ss:$8 sps:$4 sm:$0xff]   ;;  %v801_v21 = vld [vmem:[#allocation5 + $0x130] ss:$8 sps:$4 sm:$0xff]   ;;  %v775_v22 = vld [vmem:[#allocation5 + $0x60] ss:$8 sps:$4 sm:$0xff]  }
  0x3f   :  { %v803_v23 = vld [vmem:[#allocation5 + $0x144] ss:$8 sps:$4 sm:$0xff]   ;;  %v776_v24 = vld [vmem:[#allocation5 + $0x74] ss:$8 sps:$4 sm:$0xff]   ;;  %v778_v25 = vld [vmem:[#allocation5 + $0x70] ss:$8 sps:$4 sm:$0xff]  }
  0x40   :  { %411 = vmatpush1.bf16.msra.mxu1 %v789_v15  ;;  %v807_v26 = vld [vmem:[#allocation5 + $0x140] ss:$8 sps:$4 sm:$0xff]   ;;  %v809_v27 = vld [vmem:[#allocation5 + $0x154] ss:$8 sps:$4 sm:$0xff]   ;;  %v781_v28 = vld [vmem:[#allocation5 + $0x84] ss:$8 sps:$4 sm:$0xff]  }
  0x41   :  { %372 = vmatpush1.bf16.msra.mxu0 %v763_v6  ;;  %412 = vmatprep.subr.bf16.mxu1 %v791_v16  ;;  %v813_v29 = vld [vmem:[#allocation5 + $0x150] ss:$8 sps:$4 sm:$0xff]   ;;  %v784_v30 = vld [vmem:[#allocation5 + $0x80] ss:$8 sps:$4 sm:$0xff]   ;;  %v815_v31 = vld [vmem:[#allocation5 + $0x164] ss:$8 sps:$4 sm:$0xff]  }
  0x42   :  { %373 = vmatprep.subr.bf16.mxu0 %v764_v7  ;;  %v787_v32 = vld [vmem:[#allocation5 + $0x94] ss:$8 sps:$4 sm:$0xff]   ;;  %v790_v34 = vld [vmem:[#allocation5 + $0x90] ss:$8 sps:$4 sm:$0xff]   ;;  %v819_v36 = vld [vmem:[#allocation5 + $0x160] ss:$8 sps:$4 sm:$0xff]  }
  0x43   :  { %v821_v37 = vld [vmem:[#allocation5 + $0x174] ss:$8 sps:$4 sm:$0xff]   ;;  %v793_v38 = vld [vmem:[#allocation5 + $0xa4] ss:$8 sps:$4 sm:$0xff]   ;;  %v796_v39 = vld [vmem:[#allocation5 + $0xa0] ss:$8 sps:$4 sm:$0xff]  }
  0x44   :  { %413 = vmatpush1.bf16.msra.mxu1 %v795_v18  ;;  %v825_v40 = vld [vmem:[#allocation5 + $0x170] ss:$8 sps:$4 sm:$0xff]   ;;  %v827_v42 = vld [vmem:[#allocation7 + $0x40] sm:$0xff]   ;;  %v799_v43 = vld [vmem:[#allocation5 + $0xb4] ss:$8 sps:$4 sm:$0xff]   ;;  %v118_v12 = vshrl.u32 %v117_v11, 7 }
  0x45   :  { %374 = vmatpush1.bf16.msra.mxu0 %v766_v8  ;;  %414 = vmatprep.subr.bf16.mxu1 %v797_v19  ;;  %v63_v41 = vld [vmem:[#allocation2 + $0x10] sm:$0xff]  ;;  %v828_v46 = vld [vmem:[#allocation7] sm:$0xff]   ;;  %v829_v48 = vld [vmem:[#allocation7 + $0x48] sm:$0xff]   ;;  %s949_s8 = smov [#allocation8]   ;;  %vm637_vm0 = vcmask 64512  }
  0x46   :  { %375 = vmatprep.subr.bf16.mxu0 %v767_v10  ;;  %v802_v44 = vld [vmem:[#allocation5 + $0xb0] ss:$8 sps:$4 sm:$0xff]   ;;  %v66_v45 = vpack.c.bf16 %v63_v41, %v63_v41  ;;  %v805_v47 = vld [vmem:[#allocation5 + $0xc4] ss:$8 sps:$4 sm:$0xff]   ;;  %v808_v50 = vld [vmem:[#allocation5 + $0xc0] ss:$8 sps:$4 sm:$0xff]  }
  0x47   :  { %v830_v49 = vld [vmem:[#allocation7 + $0x8] sm:$0xff]   ;;  %v831_v51 = vld [vmem:[#allocation7 + $0x50] sm:$0xff]   ;;  %v833_v55 = vld [vmem:[#allocation7 + $0x58] sm:$0xff]   ;;  %v123_v15 = vsub.s32 1, %v118_v12  ;;  %s645_s9 = sshll.u32 %s949_s8, 4  ;;  %s646_s9 = int_to_ptr.vmem [resolvable:$true] %s645_s9 }
  0x48   :  { %415 = vmatpush1.bf16.msra.mxu1 %v801_v21  ;;  %v811_v52 = vld [vmem:[#allocation5 + $0xd4] ss:$8 sps:$4 sm:$0xff]   ;;  %v814_v54 = vld [vmem:[#allocation5 + $0xd0] ss:$8 sps:$4 sm:$0xff]   ;;  %v817_v56 = vld [vmem:[#allocation5 + $0xe4] ss:$8 sps:$4 sm:$0xff]   ;;  %p918_p11 = scmp.lt.s32.totalorder %s646_s9, %s646_s9 }
  0x49   :  { %376 = vmatpush1.bf16.msra.mxu0 %v769_v13  ;;  %416 = vmatprep.subr.bf16.mxu1 %v803_v23  ;;  %v832_v53 = vld [vmem:[#allocation7 + $0x10] sm:$0xff]   ;;  %v834_v57 = vld [vmem:[#allocation7 + $0x18] sm:$0xff]   ;;  %v820_v58 = vld [vmem:[#allocation5 + $0xe0] ss:$8 sps:$4 sm:$0xff]   ;;  %v119_v13 = vsub.s32 0, %v118_v12 }
  0x4a   :  { %377 = vmatprep.subr.bf16.mxu0 %v770_v14  ;;  %v835_v59 = vld [vmem:[#allocation7 + $0x60] sm:$0xff]   ;;  %v823_v60 = vld [vmem:[#allocation5 + $0xf4] ss:$8 sps:$4 sm:$0xff]   ;;  %v826_v62 = vld [vmem:[#allocation5 + $0xf0] ss:$8 sps:$4 sm:$0xff]  }
  0x4b   :  { %v836_v61 = vld [vmem:[#allocation7 + $0x20] sm:$0xff]   ;;  %v61_v63 = vld [vmem:[#allocation2] sm:$0xff]  ;;  %v839_v3 = vld [vmem:[#allocation7 + $0x70] sm:$0xff]  }
  0x4c   :  { %417 = vmatpush1.bf16.msra.mxu1 %v807_v26  ;;  %v64_v0 = vpack.c.bf16 %v61_v63, %v61_v63  ;;  %v837_v1 = vld [vmem:[#allocation7 + $0x68] sm:$0xff]   ;;  %v840_v4 = vld [vmem:[#allocation7 + $0x30] sm:$0xff]   ;;  %v841_v5 = vld [vmem:[#allocation7 + $0x78] sm:$0xff]  }
  0x4d   :  { %378 = vmatpush1.bf16.msra.mxu0 %v772_v17  ;;  %418 = vmatprep.subr.bf16.mxu1 %v809_v27  ;;  %v838_v2 = vld [vmem:[#allocation7 + $0x28] sm:$0xff]   ;;  %v842_v6 = vld [vmem:[#allocation7 + $0x38] sm:$0xff]  }
  0x4e   :  { %379 = vmatprep.subr.bf16.mxu0 %v773_v20  ;;  %v115_v14 = vld [vmem:[%s1036_s2] sm:$0x3] }
  0x4f   :  { %v120_v16 = vrot.slane %v115_v14, %v119_v13  ;;  %v124_v17 = vrot.slane %v115_v14, %v123_v15 }
  0x50   :  { %419 = vmatpush1.bf16.msra.mxu1 %v813_v29 }
  0x51   :  { %380 = vmatpush1.bf16.msra.mxu0 %v775_v22  ;;  %420 = vmatprep.subr.bf16.mxu1 %v815_v31 }
  0x52   :  { %381 = vmatprep.subr.bf16.mxu0 %v776_v24 }
  0x54   :  { %421 = vmatpush1.bf16.msra.mxu1 %v819_v36 }
  0x55   :  { %382 = vmatpush1.bf16.msra.mxu0 %v778_v25  ;;  %422 = vmatprep.subr.bf16.mxu1 %v821_v37 }
  0x56   :  { %383 = vmatprep.subr.bf16.mxu0 %v781_v28 }
  0x58   :  { %423 = vmatpush1.bf16.msra.mxu1 %v825_v40 }
  0x59   :  { %384 = vmatpush1.bf16.msra.mxu0 %v784_v30  ;;  %720 = vmatprep.subr.bf16.mxu1 %v827_v42 }
  0x5a   :  { %385 = vmatprep.subr.bf16.mxu0 %v787_v32  ;;  %v703_v32 = vld [vmem:[%s1038_s4] ss:$0 sm:$0xff]  ;;  %s913_s4 = scalar_lea.vmem %s646_s9, 128 }
  0x5b   :  { %441 = vmatmul.mubr.bf16.vlgmr.msra.gmra.mrb[0].mxu1 %v66_v45  ;;  %p914_p10 = scmp.ne.s32.totalorder %s646_s9, %s913_s4  ;;  %p919_p12 = scmp.lt.s32.totalorder %s913_s4, %s913_s4 }
  0x5c   :  { %721 = vmatpush3.bf16.msra.mxu1 %v828_v46 }
  0x5d   :  { %386 = vmatpush1.bf16.msra.mxu0 %v790_v34  ;;  %722 = vmatprep.subr.bf16.mxu1 %v829_v48  ;;  %p920_p13 = por %p919_p12, %p918_p11 }
  0x5e   :  { %387 = vmatprep.subr.bf16.mxu0 %v793_v38 }
  0x5f   :  { %p921_p0 = pnand %p920_p13, %p914_p10 }
  0x60   :  { %723 = vmatpush3.bf16.msra.mxu1 %v830_v49 }
  0x61   :  { %388 = vmatpush1.bf16.msra.mxu0 %v796_v39  ;;  %724 = vmatprep.subr.bf16.mxu1 %v831_v51 }
  0x62   :  { %389 = vmatprep.subr.bf16.mxu0 %v799_v43 }
  0x64   :  { %725 = vmatpush3.bf16.msra.mxu1 %v832_v53 }
  0x65   :  { %390 = vmatpush1.bf16.msra.mxu0 %v802_v44  ;;  %726 = vmatprep.subr.bf16.mxu1 %v833_v55 }
  0x66   :  { %391 = vmatprep.subr.bf16.mxu0 %v805_v47 }
  0x68   :  { %727 = vmatpush3.bf16.msra.mxu1 %v834_v57 }
  0x69   :  { %392 = vmatpush1.bf16.msra.mxu0 %v808_v50  ;;  %728 = vmatprep.subr.bf16.mxu1 %v835_v59 }
  0x6a   :  { %393 = vmatprep.subr.bf16.mxu0 %v811_v52 }
  0x6c   :  { %729 = vmatpush3.bf16.msra.mxu1 %v836_v61 }
  0x6d   :  { %394 = vmatpush1.bf16.msra.mxu0 %v814_v54  ;;  %730 = vmatprep.subr.bf16.mxu1 %v837_v1 }
  0x6e   :  { %395 = vmatprep.subr.bf16.mxu0 %v817_v56 }
  0x70   :  { %731 = vmatpush3.bf16.msra.mxu1 %v838_v2 }
  0x71   :  { %396 = vmatpush1.bf16.msra.mxu0 %v820_v58  ;;  %732 = vmatprep.subr.bf16.mxu1 %v839_v3 }
  0x72   :  { %397 = vmatprep.subr.bf16.mxu0 %v823_v60 }
  0x74   :  { %733 = vmatpush3.bf16.msra.mxu1 %v840_v4 }
  0x75   :  { %398 = vmatpush1.bf16.msra.mxu0 %v826_v62  ;;  %734 = vmatprep.subr.bf16.mxu1 %v841_v5 }
  0x78   :  { %400 = vmatmul.mubr.bf16.vlgmr.msra.gmra.mrb[0].mxu0 %v64_v0  ;;  %735 = vmatpush3.bf16.msra.mxu1 %v842_v6 }
 0x12e   :  { %v442_v7 = vpop.f32.mrb[0].mxu1 }
 0x12f   :  { %v444_v8 = vpop.f32.mrb[1].mxu1 }
 0x130   :  { %v446_v9 = vpop.f32.mrb[2].mxu1 }
 0x131   :  { %v447_v10 = vpop.f32.mrb[3].mxu1 }
 0x14b   :  { %v401_v18 = vpop.f32.mrb[0].mxu0 }
 0x14c   :  { %v402_v19 = vadd.f32 %v401_v18, %v120_v16  ;;  %v403_v20 = vpop.f32.mrb[1].mxu0 }
 0x14d   :  { %v404_v21 = vadd.f32 %v403_v20, %v124_v17  ;;  %v405_v22 = vpop.f32.mrb[2].mxu0 }
 0x14e   :  { %v443_v23 = vadd.f32 %v442_v7, %v402_v19  ;;  %v406_v24 = vpop.f32.mrb[3].mxu0 }
 0x14f   :  { %v445_v25 = vadd.f32 %v444_v8, %v404_v21 }
 0x150   :  { %v449_v26 = vmax.f32 %v443_v23, 0.0 }
 0x151   :  { %v450_v27 = vmax.f32 %v445_v25, 0.0 }
 0x152   :  { %v451_v29 = vpack.c.bf16 %v449_v26, %v449_v26 }
 0x153   :  { %v452_v28 = vpack.c.bf16 %v450_v27, %v450_v27 }
 0x155   :  { %620 = vmatprep.mubr.bf16.mxu1 %v452_v28 }
 0x156   :  { %621 = vmatmul.mubr.bf16.vlgmr.msra.gmra.mrb[4].mxu1 %v451_v29 }
 0x229   :  { %v736_v30 = vpop.f32.mrb[4].mxu1 }
 0x22a   :  { %v737_v31 = vpop.f32.mrb[5].mxu1 }
 0x22b   :  { %v738_v33 = vadd.f32 %v737_v31, %v736_v30  ;;  %v739_v34 = vpop.f32.mrb[6].mxu1 }
 0x22c   :  { %v740_v35 = vpop.f32.mrb[7].mxu1 }
 0x22d   :  { %v623_v36 = vadd.f32 %v738_v33, %v703_v32 }
 0x22f   :  { %628 = vmax.xlane.f32.xlu0 %v623_v36 }
 0x2bc   :  { %v629_v37 = vpop.xlane.xlu0 %628 }
 0x2bd   :  { %v630_v38 = vsub.f32 %v623_v36, %v629_v37 }
 0x2bf   :  { %v631_v39 = vmul.f32 1.442695, %v630_v38 }
 0x2c1   :  { %843 = vpow2.f32 %v631_v39 }
 0x2cb   :  { %v844_v40 = vpop.eup %843 }
 0x2cc   :  { %633 = vadd.xlane.f32.xlu0 %v844_v40 }
 0x359   :  { %v634_v41 = vpop.xlane.xlu0 %633 }
 0x35a   :  { %845 = vrcp.f32 %v634_v41 }
 0x364   :  { %v846_v42 = vpop.eup %845 }
 0x365   :  { %v636_v43 = vmul.f32 %v846_v42, %v844_v40 }
 0x367   :  { %638 = vst.msk [vmem:[#allocation8] sm:$0xff] %vm637_vm0, %v636_v43 }
 0x368   :  { %924 = shalt.err (!%p921_p0)
}
 0x369   :  { %s925_s12 = scalar_lea.hbm %s1039_s5, 128 }
 0x36a   :  { %p926_p1 = scmp.ne.s32.totalorder %s1039_s5, %s925_s12  ;;  %p929_p2 = scmp.lt.u32.totalorder %s925_s12, %s1039_s5 }
 0x36c   :  { %p931_p3 = pnand %p929_p2, %p926_p1 }
 0x36e   :  { %934 = shalt.err (!%p931_p3)
}
 0x36f   :  { %648 = dma.vmem_to_hbm [thread:$0]  %s646_s9, 128, %s1039_s5, [#allocation4]  }
 0x370   :  { %939 = dma.done.wait [#allocation4], 128  }
 0x371   :  { %940 = vsyncadd [#allocation4], 4294967168 }
 0x372   :  { %652 = vsyncpa [#allocation3], 1 }
 0x373   :  { %653 = vsyncpa [#allocation6], 1 }
 0x374   :  { %654 = vsyncpa [#allocation4], 1 }

</bundles_post_ra>
